<compile_context>
chip_gen: v5e
topology: v5e:2x2
jax: 0.10.0
libtpu: 0.0.40
codegen_flags: <defaults>
</compile_context>

<pallas_src>
import functools

import numpy as np
import jax
import jax.numpy as jnp
from jax.experimental import pallas as pl
from jax.experimental.pallas import tpu as pltpu


# ---------------------------------------------------------------------------
# Fused Pallas kernel: one grid step == one timestep of the lattice recursion
# ---------------------------------------------------------------------------

def _lattice_kernel(n_in_ref, nw_ref,                     # SMEM schedule tables
                    x_ref, w_ref, scat_ref,               # streamed per-step data
                    mi_w_ref, mi_b_ref, awhh_ref,         # MultiInput cell (packed)
                    wc_w_ref, wc_b_ref,                   # Word cell (packed)
                    cls_w_ref, cls_b_ref,                 # classifier
                    out_ref,                              # (1, 1, LPAD) logits block
                    hx_ref, cx_ref, pend_ref,             # VMEM scratch (persistent)
                    *, hidden, maxn, win):
    H = hidden
    t = pl.program_id(0)
    dot = functools.partial(jnp.dot, preferred_element_type=jnp.float32)

    # Initialize recurrent state + pending lattice-cell buffer on the first step.
    @pl.when(t == 0)
    def _():
        hx_ref[...] = jnp.zeros_like(hx_ref)
        cx_ref[...] = jnp.zeros_like(cx_ref)
        pend_ref[...] = jnp.zeros_like(pend_ref)

    x_t = x_ref[0]                                        # (1, D)
    h0 = hx_ref[...]                                      # (1, H)
    c0 = cx_ref[...]                                      # (1, H)

    # --- MultiInputLSTMCell pre-activations: one fused lane-dense matmul ----
    xh = jnp.concatenate([x_t, h0], axis=1)               # (1, D+H)
    pre = dot(xh, mi_w_ref[...]) + mi_b_ref[...]          # (1, 4H) = [i|o|g|alpha]
    sig = jax.nn.sigmoid(pre)                             # one full-width EUP pass
    i_g = sig[:, 0:H]
    o_g = sig[:, H:2 * H]
    g_g = jnp.tanh(pre[:, 2 * H:3 * H])
    alpha_wi = pre[:, 3 * H:4 * H]                        # raw: no alpha bias (ref)

    n_t = n_in_ref[t]                                     # #incoming lattice cells

    # Branch A: plain cell update (no incoming lattice memory).
    simple = (1.0 - i_g) * c0 + i_g * g_g

    # Branch B: softmax merge over [i, alpha_1..n] against [g, c_1..n].
    base = pl.multiple_of(t * maxn, maxn)                 # 8-aligned dynamic offset
    cin = pend_ref[pl.ds(base, maxn), :]                  # (MAXN, H)
    rows = jax.lax.broadcasted_iota(jnp.int32, (maxn, H), 0)
    valid = rows < n_t
    cin_m = jnp.where(valid, cin, 0.0)
    alpha = jax.nn.sigmoid(alpha_wi + dot(cin_m, awhh_ref[...]))
    ealpha = jnp.where(valid, jnp.exp(alpha), 0.0)
    ei = jnp.exp(i_g)
    denom = ei + jnp.sum(ealpha, axis=0, keepdims=True) + 1e-12
    num = ei * g_g + jnp.sum(ealpha * cin_m, axis=0, keepdims=True)
    merged = num / denom

    c1 = jnp.where(n_t > 0, merged, simple)               # vreg select, no pl.when
    h1 = o_g * jnp.tanh(c1)
    hx_ref[...] = h1
    cx_ref[...] = c1

    nw_t = nw_ref[t]                                      # #words starting at t

    # --- WordLSTMCell (uses freshly updated h1, c1); skipped when no words ---
    @pl.when(nw_t > 0)
    def _():
        w_emb = w_ref[0]                                  # (MAXW, Dw)
        h_b = jnp.broadcast_to(h1, (w_emb.shape[0], H))
        wh = jnp.concatenate([w_emb, h_b], axis=1)        # (MAXW, Dw+H)
        pre_w = dot(wh, wc_w_ref[...]) + wc_b_ref[...]    # (MAXW, 4H); last H unused
        sig_w = jax.nn.sigmoid(pre_w)
        f_g = sig_w[:, 0:H]
        iw_g = sig_w[:, H:2 * H]
        gw_g = jnp.tanh(pre_w[:, 2 * H:3 * H])
        ct = f_g * c1 + iw_g * gw_g                       # (MAXW, H)
        # Windowed scatter-as-matmul: (WIN, MAXW) x (MAXW, H) routes each word's
        # cell to its (end position, slot) row inside the Lmax-bounded window.
        upd = dot(scat_ref[0], ct)                        # (WIN, H)
        wstart = pl.multiple_of(t * maxn, maxn)
        pend_ref[pl.ds(wstart, win), :] = pend_ref[pl.ds(wstart, win), :] + upd

    # --- fused classifier: lane-dense (1, LPAD) logits for this timestep -----
    out_ref[...] = (dot(h1, cls_w_ref[...]) + cls_b_ref[...])[None]


def _build_lattice_call(seq_len, char_dim, word_dim, hidden, lpad,
                        maxn, maxw, lmax):
    win = lmax * maxn
    kernel = functools.partial(_lattice_kernel, hidden=hidden, maxn=maxn, win=win)
    smem = pl.BlockSpec(memory_space=pltpu.MemorySpace.SMEM)
    vmem = pl.BlockSpec(memory_space=pltpu.MemorySpace.VMEM)   # whole array, resident
    return pl.pallas_call(
        kernel,
        out_shape=jax.ShapeDtypeStruct((seq_len, 1, lpad), jnp.float32),
        grid=(seq_len,),
        in_specs=[
            smem, smem,                                               # n_in, nw
            pl.BlockSpec((1, 1, char_dim), lambda t: (t, 0, 0)),      # x_t
            pl.BlockSpec((1, maxw, word_dim), lambda t: (t, 0, 0)),   # word embs @ t
            pl.BlockSpec((1, win, maxw), lambda t: (t, 0, 0)),        # scatter window
            vmem, vmem, vmem,                                         # mi_w, mi_b, awhh
            vmem, vmem,                                               # wc_w, wc_b
            vmem, vmem,                                               # cls_w, cls_b
        ],
        out_specs=pl.BlockSpec((1, 1, lpad), lambda t: (t, 0, 0)),
        scratch_shapes=[
            pltpu.VMEM((1, hidden), jnp.float32),                     # hx
            pltpu.VMEM((1, hidden), jnp.float32),                     # cx
            pltpu.VMEM(((seq_len + lmax) * maxn, hidden), jnp.float32),  # pending cells
        ],
        compiler_params=pltpu.CompilerParams(
            dimension_semantics=("arbitrary",),
            vmem_limit_bytes=32 * 1024 * 1024),
    )


# ---------------------------------------------------------------------------
# Parameter construction (mirrors the PyTorch __init__, stored in fused layout)
# ---------------------------------------------------------------------------

def _orthogonal(key, shape):
    rows, cols = shape
    a = jax.random.normal(key, (max(rows, cols), min(rows, cols)), jnp.float32)
    q, r = jnp.linalg.qr(a)
    q = q * jnp.sign(jnp.diagonal(r))
    if rows < cols:
        q = q.T
    return q[:rows, :cols].astype(jnp.float32)


def init_lattice_params(key, char_vocab, char_dim, hidden, word_vocab,
                        word_dim, num_labels):
    ks = jax.random.split(key, 8)
    p = {}

    bc = float(np.sqrt(3.0 / char_dim))
    bw = float(np.sqrt(3.0 / word_dim))
    p["char_emb"] = jax.random.uniform(ks[0], (char_vocab, char_dim),
                                       jnp.float32, -bc, bc)
    p["word_emb"] = jax.random.uniform(ks[1], (word_vocab, word_dim),
                                       jnp.float32, -bw, bw)

    eye3 = jnp.tile(jnp.eye(hidden, dtype=jnp.float32), (1, 3))
    zH = jnp.zeros((hidden, hidden), jnp.float32)

    # MultiInputLSTMCell, fused layout: W = vstack([ [weight_ih | alpha_weight_ih],
    #                                               [weight_hh | 0             ] ])
    # shape (D+H, 4H); bias = [bias | 0] (alpha lanes must stay zero -> matches ref).
    mi_x = jnp.concatenate([_orthogonal(ks[2], (char_dim, 3 * hidden)),
                            _orthogonal(ks[3], (char_dim, hidden))], axis=1)
    mi_h = jnp.concatenate([eye3, zH], axis=1)
    p["mi_w"] = jnp.concatenate([mi_x, mi_h], axis=0)          # (D+H, 4H)
    p["mi_b"] = jnp.zeros((1, 4 * hidden), jnp.float32)
    p["awhh"] = jnp.eye(hidden, dtype=jnp.float32)

    # WordLSTMCell, fused layout: (Dw+H, 4H), last H lanes unused (zero).
    wc_x = jnp.concatenate([_orthogonal(ks[4], (word_dim, 3 * hidden)),
                            jnp.zeros((word_dim, hidden), jnp.float32)], axis=1)
    wc_h = jnp.concatenate([eye3, zH], axis=1)
    p["wc_w"] = jnp.concatenate([wc_x, wc_h], axis=0)          # (Dw+H, 4H)
    p["wc_b"] = jnp.zeros((1, 4 * hidden), jnp.float32)

    # Classifier nn.Linear(hidden, num_labels), zero-padded to 128 lanes.
    lpad = 128 * int(pl.cdiv(num_labels, 128))
    bl = float(1.0 / np.sqrt(hidden))
    cls_w = jax.random.uniform(ks[5], (hidden, num_labels), jnp.float32, -bl, bl)
    cls_b = jax.random.uniform(ks[6], (1, num_labels), jnp.float32, -bl, bl)
    p["cls_w"] = jnp.zeros((hidden, lpad), jnp.float32).at[:, :num_labels].set(cls_w)
    p["cls_b"] = jnp.zeros((1, lpad), jnp.float32).at[:, :num_labels].set(cls_b)
    p["num_labels"] = num_labels
    p["lpad"] = lpad
    return p


# ---------------------------------------------------------------------------
# Forward: build the lattice schedule (host) and run the fused kernel
# ---------------------------------------------------------------------------

def lattice_lstm_forward(params, input_seq, skip_input_list, hidden_dim,
                         maxn=8, maxw=4, max_word_len=4):
    # maxn=8 keeps every dynamic pend offset sublane-aligned (multiple of 8).
    skip_input = skip_input_list[0]
    seq_len = int(input_seq.shape[1])
    assert int(input_seq.shape[0]) == 1                    # batch_size == 1 (as in ref)
    num_labels = params["num_labels"]
    lpad = params["lpad"]
    win = max_word_len * maxn

    # ---- host-side schedule from the (Python) lattice structure ----
    n_in = np.zeros((seq_len,), np.int32)       # #cells arriving at each position
    nw = np.zeros((seq_len,), np.int32)         # #words starting at each position
    word_ids = np.zeros((seq_len, maxw), np.int32)
    scat = np.zeros((seq_len, win, maxw), np.float32)      # windowed one-hot scatter
    for t in range(seq_len):
        if skip_input[t]:
            ids, lengths = skip_input[t]
            assert len(ids) <= maxw, "increase maxw"
            nw[t] = len(ids)
            for w, (wid, length) in enumerate(zip(ids, lengths)):
                word_ids[t, w] = wid
                end = t + length - 1
                # Cells appended at position `end` only matter if end > t (the
                # PyTorch loop already consumed input_c_list[t]) and end < seq_len.
                if t < end < seq_len:
                    assert length <= max_word_len, "increase max_word_len"
                    slot = int(n_in[end])
                    assert slot < maxn, "increase maxn"
                    scat[t, (end - t) * maxn + slot, w] = 1.0
                    n_in[end] += 1

    char_dim = int(params["char_emb"].shape[1])
    word_dim = int(params["word_emb"].shape[1])

    # Embedding gathers (one XLA op each).
    # TODO(synk): word_dropout (nn.Dropout) is identity at inference; not modeled.
    x_all = params["char_emb"][input_seq[0]][:, None, :]   # (T, 1, D)
    w_all = params["word_emb"][jnp.asarray(word_ids)]      # (T, MAXW, Dw)

    call = _build_lattice_call(seq_len, char_dim, word_dim, hidden_dim, lpad,
                               maxn, maxw, max_word_len)
    logits_pad = call(jnp.asarray(n_in), jnp.asarray(nw),
                      x_all, w_all, jnp.asarray(scat),
                      params["mi_w"], params["mi_b"], params["awhh"],
                      params["wc_w"], params["wc_b"],
                      params["cls_w"], params["cls_b"])    # (T, 1, LPAD)

    logits = logits_pad[:, 0, :num_labels]
    # torch: stack -> (T,1,H), unsqueeze(0) -> (1,T,1,H) -> classifier -> (1,T,1,L)
    return logits.reshape(1, seq_len, 1, num_labels)


# ---------------------------------------------------------------------------
# Demo
# ---------------------------------------------------------------------------

if __name__ == "__main__":
    CHAR_VOCAB = 20
    CHAR_DIM = 16
    HIDDEN = 32
    WORD_VOCAB = 30
    WORD_DIM = 16
    NUM_LABELS = 8
    SEQ_LEN = 8

    key = jax.random.PRNGKey(0)
    pkey, dkey = jax.random.split(key)
    params = init_lattice_params(pkey, CHAR_VOCAB, CHAR_DIM, HIDDEN,
                                 WORD_VOCAB, WORD_DIM, NUM_LABELS)

    input_seq = jax.random.randint(dkey, (1, SEQ_LEN), 1, CHAR_VOCAB,
                                   dtype=jnp.int32)

    # Lattice structure: (word_ids, word_lengths) per starting position.
    skip_input = [None] * SEQ_LEN
    skip_input[0] = ([3, 7], [2, 3])     # words ending at positions 1 and 2
    skip_input[2] = ([5], [2])           # word ending at position 3
    skip_input[5] = ([1, 4], [3, 2])     # words ending at positions 7 and 6
    skip_input_list = [skip_input]

    logits = lattice_lstm_forward(params, input_seq, skip_input_list, HIDDEN)
    jax.block_until_ready(logits)
    assert logits.shape == (1, SEQ_LEN, 1, NUM_LABELS)
    assert bool(jnp.all(jnp.isfinite(logits)))
    print("KERNEL_OK")
</pallas_src>

<mosaic_0001>
module attributes {stable_mosaic.version = 11 : i64} {
  func.func @_lattice_kernel(%arg0: i32, %arg1: memref<8xi32, #tpu.memory_space<smem>>, %arg2: memref<8xi32, #tpu.memory_space<smem>>, %arg3: memref<1x1x16xf32, #tpu.memory_space<vmem>>, %arg4: memref<1x4x16xf32, #tpu.memory_space<vmem>>, %arg5: memref<1x32x4xf32, #tpu.memory_space<vmem>>, %arg6: memref<48x128xf32, #tpu.memory_space<vmem>>, %arg7: memref<1x128xf32, #tpu.memory_space<vmem>>, %arg8: memref<32x32xf32, #tpu.memory_space<vmem>>, %arg9: memref<48x128xf32, #tpu.memory_space<vmem>>, %arg10: memref<1x128xf32, #tpu.memory_space<vmem>>, %arg11: memref<32x128xf32, #tpu.memory_space<vmem>>, %arg12: memref<1x128xf32, #tpu.memory_space<vmem>>, %arg13: memref<1x1x128xf32, #tpu.memory_space<vmem>>, %arg14: memref<1x32xf32, #tpu.memory_space<vmem>>, %arg15: memref<1x32xf32, #tpu.memory_space<vmem>>, %arg16: memref<96x32xf32, #tpu.memory_space<vmem>>) attributes {dimension_semantics = [#tpu.dimension_semantics<arbitrary>], iteration_bounds = array<i64: 8>, scalar_prefetch = 0 : i64, scratch_operands = 3 : i64, tpu.core_type = #tpu.core_type<tc>, window_params = [{transform_indices = @transform_0, window_bounds = array<i64: 8>}, {transform_indices = @transform_1, window_bounds = array<i64: 8>}, {transform_indices = @transform_2, window_bounds = array<i64: 1, 1, 16>}, {transform_indices = @transform_3, window_bounds = array<i64: 1, 4, 16>}, {transform_indices = @transform_4, window_bounds = array<i64: 1, 32, 4>}, {pipeline_mode = #tpu.pipeline_mode<synchronous>, transform_indices = @transform_5, window_bounds = array<i64: 48, 128>}, {pipeline_mode = #tpu.pipeline_mode<synchronous>, transform_indices = @transform_6, window_bounds = array<i64: 1, 128>}, {pipeline_mode = #tpu.pipeline_mode<synchronous>, transform_indices = @transform_7, window_bounds = array<i64: 32, 32>}, {pipeline_mode = #tpu.pipeline_mode<synchronous>, transform_indices = @transform_8, window_bounds = array<i64: 48, 128>}, {pipeline_mode = #tpu.pipeline_mode<synchronous>, transform_indices = @transform_9, window_bounds = array<i64: 1, 128>}, {pipeline_mode = #tpu.pipeline_mode<synchronous>, transform_indices = @transform_10, window_bounds = array<i64: 32, 128>}, {pipeline_mode = #tpu.pipeline_mode<synchronous>, transform_indices = @transform_11, window_bounds = array<i64: 1, 128>}, {transform_indices = @transform_12, window_bounds = array<i64: 1, 1, 128>}]} {
    %c0_i32 = arith.constant 0 : i32
    %0 = arith.cmpi eq, %arg0, %c0_i32 : i32
    %1 = arith.extui %0 : i1 to i32
    %c0_i32_0 = arith.constant 0 : i32
    %2 = arith.cmpi ne, %1, %c0_i32_0 : i32
    scf.if %2 {
      %cst_38 = arith.constant 0.000000e+00 : f32
      %79 = vector.broadcast %cst_38 : f32 to vector<1x32xf32>
      %c0_39 = arith.constant 0 : index
      %c0_40 = arith.constant 0 : index
      %80 = vector.load %arg14[%c0_39, %c0_40] : memref<1x32xf32, #tpu.memory_space<vmem>>, vector<1x32xf32>
      tpu.vector_store %arg14[%c0_39, %c0_40], %79 {strides = array<i32>} : memref<1x32xf32, #tpu.memory_space<vmem>>, vector<1x32xf32>,
      %cst_41 = arith.constant 0.000000e+00 : f32
      %81 = vector.broadcast %cst_41 : f32 to vector<1x32xf32>
      %c0_42 = arith.constant 0 : index
      %c0_43 = arith.constant 0 : index
      %82 = vector.load %arg15[%c0_42, %c0_43] : memref<1x32xf32, #tpu.memory_space<vmem>>, vector<1x32xf32>
      tpu.vector_store %arg15[%c0_42, %c0_43], %81 {strides = array<i32>} : memref<1x32xf32, #tpu.memory_space<vmem>>, vector<1x32xf32>,
      %cst_44 = arith.constant 0.000000e+00 : f32
      %83 = vector.broadcast %cst_44 : f32 to vector<96x32xf32>
      %c0_45 = arith.constant 0 : index
      %c0_46 = arith.constant 0 : index
      %84 = vector.load %arg16[%c0_45, %c0_46] : memref<96x32xf32, #tpu.memory_space<vmem>>, vector<96x32xf32>
      tpu.vector_store %arg16[%c0_45, %c0_46], %83 {strides = array<i32>} : memref<96x32xf32, #tpu.memory_space<vmem>>, vector<96x32xf32>,
    } else {
    }
    %c0 = arith.constant 0 : index
    %c0_1 = arith.constant 0 : index
    %c0_2 = arith.constant 0 : index
    %3 = vector.load %arg3[%c0, %c0_1, %c0_2] : memref<1x1x16xf32, #tpu.memory_space<vmem>>, vector<1x1x16xf32>
    %4 = vector.shape_cast %3 : vector<1x1x16xf32> to vector<1x16xf32>
    %c0_3 = arith.constant 0 : index
    %c0_4 = arith.constant 0 : index
    %5 = vector.load %arg14[%c0_3, %c0_4] : memref<1x32xf32, #tpu.memory_space<vmem>>, vector<1x32xf32>
    %c0_5 = arith.constant 0 : index
    %c0_6 = arith.constant 0 : index
    %6 = vector.load %arg15[%c0_5, %c0_6] : memref<1x32xf32, #tpu.memory_space<vmem>>, vector<1x32xf32>
    %7 = tpu.concatenate %4, %5 in 1 : vector<1x16xf32>, vector<1x32xf32> -> vector<1x48xf32>
    %c0_7 = arith.constant 0 : index
    %c0_8 = arith.constant 0 : index
    %8 = vector.load %arg6[%c0_7, %c0_8] : memref<48x128xf32, #tpu.memory_space<vmem>>, vector<48x128xf32>
    %cst = arith.constant dense<0.000000e+00> : vector<1x128xf32>
    %9 = tpu.matmul %7, %8, %cst {dimension_numbers = #tpu.dot_dimension_numbers<[1], [0], [0], [1], [0, 0, 1, 1], [], []>} : vector<1x48xf32>, vector<48x128xf32>, vector<1x128xf32> -> vector<1x128xf32>
    %c0_9 = arith.constant 0 : index
    %c0_10 = arith.constant 0 : index
    %10 = vector.load %arg7[%c0_9, %c0_10] : memref<1x128xf32, #tpu.memory_space<vmem>>, vector<1x128xf32>
    %11 = arith.addf %9, %10 : vector<1x128xf32>
    %12 = arith.negf %11 : vector<1x128xf32>
    %13 = math.exp %12 : vector<1x128xf32>
    %cst_11 = arith.constant 1.000000e+00 : f32
    %14 = vector.broadcast %cst_11 : f32 to vector<1x128xf32>
    %15 = arith.addf %14, %13 : vector<1x128xf32>
    %16 = arith.divf %14, %15 : vector<1x128xf32>
    %17 = vector.extract_strided_slice %16 {offsets = [0, 0], sizes = [1, 32], strides = [1, 1]} : vector<1x128xf32> to vector<1x32xf32>
    %18 = vector.extract_strided_slice %16 {offsets = [0, 32], sizes = [1, 32], strides = [1, 1]} : vector<1x128xf32> to vector<1x32xf32>
    %19 = vector.extract_strided_slice %11 {offsets = [0, 64], sizes = [1, 32], strides = [1, 1]} : vector<1x128xf32> to vector<1x32xf32>
    %20 = math.tanh %19 : vector<1x32xf32>
    %21 = vector.extract_strided_slice %11 {offsets = [0, 96], sizes = [1, 32], strides = [1, 1]} : vector<1x128xf32> to vector<1x32xf32>
    %22 = arith.index_cast %arg0 : i32 to index
    %23 = memref.load %arg1[%22] : memref<8xi32, #tpu.memory_space<smem>>
    %cst_12 = arith.constant 1.000000e+00 : f32
    %24 = vector.broadcast %cst_12 : f32 to vector<1x32xf32>
    %25 = arith.subf %24, %17 : vector<1x32xf32>
    %26 = arith.mulf %25, %6 : vector<1x32xf32>
    %27 = arith.mulf %17, %20 : vector<1x32xf32>
    %28 = arith.addf %26, %27 : vector<1x32xf32>
    %c8_i32 = arith.constant 8 : i32
    %29 = arith.muli %arg0, %c8_i32 : i32
    %30 = tpu.assume_multiple %29, 8 : i32
    %31 = arith.index_cast %30 : i32 to index
    %c0_13 = arith.constant 0 : index
    %32 = vector.load %arg16[%31, %c0_13] : memref<96x32xf32, #tpu.memory_space<vmem>>, vector<8x32xf32>
    %33 = tpu.iota {dimensions = array<i32: 0>} : vector<8x32xi32>
    %34 = vector.broadcast %23 : i32 to vector<8x32xi32>
    %35 = arith.cmpi slt, %33, %34 : vector<8x32xi32>
    %cst_14 = arith.constant 0.000000e+00 : f32
    %36 = vector.broadcast %cst_14 : f32 to vector<8x32xf32>
    %37 = arith.select %35, %32, %36 : vector<8x32xi1>, vector<8x32xf32>
    %c0_15 = arith.constant 0 : index
    %c0_16 = arith.constant 0 : index
    %38 = vector.load %arg8[%c0_15, %c0_16] : memref<32x32xf32, #tpu.memory_space<vmem>>, vector<32x32xf32>
    %cst_17 = arith.constant dense<0.000000e+00> : vector<8x32xf32>
    %39 = tpu.matmul %37, %38, %cst_17 {dimension_numbers = #tpu.dot_dimension_numbers<[1], [0], [0], [1], [0, 0, 1, 1], [], []>} : vector<8x32xf32>, vector<32x32xf32>, vector<8x32xf32> -> vector<8x32xf32>
    %40 = vector.broadcast %21 : vector<1x32xf32> to vector<8x32xf32>
    %41 = arith.addf %40, %39 : vector<8x32xf32>
    %42 = arith.negf %41 : vector<8x32xf32>
    %43 = math.exp %42 : vector<8x32xf32>
    %cst_18 = arith.constant 1.000000e+00 : f32
    %44 = vector.broadcast %cst_18 : f32 to vector<8x32xf32>
    %45 = arith.addf %44, %43 : vector<8x32xf32>
    %46 = arith.divf %44, %45 : vector<8x32xf32>
    %47 = math.exp %46 : vector<8x32xf32>
    %cst_19 = arith.constant 0.000000e+00 : f32
    %48 = vector.broadcast %cst_19 : f32 to vector<8x32xf32>
    %49 = arith.select %35, %47, %48 : vector<8x32xi1>, vector<8x32xf32>
    %50 = math.exp %17 : vector<1x32xf32>
    %cst_20 = arith.constant dense<0.000000e+00> : vector<32xf32>
    %51 = vector.multi_reduction <add>, %49, %cst_20 [0] : vector<8x32xf32> to vector<32xf32>
    %52 = vector.shape_cast %51 : vector<32xf32> to vector<1x32xf32>
    %53 = arith.addf %50, %52 : vector<1x32xf32>
    %cst_21 = arith.constant 9.99999996E-13 : f32
    %54 = vector.broadcast %cst_21 : f32 to vector<1x32xf32>
    %55 = arith.addf %53, %54 : vector<1x32xf32>
    %56 = arith.mulf %50, %20 : vector<1x32xf32>
    %57 = arith.mulf %49, %37 : vector<8x32xf32>
    %cst_22 = arith.constant dense<0.000000e+00> : vector<32xf32>
    %58 = vector.multi_reduction <add>, %57, %cst_22 [0] : vector<8x32xf32> to vector<32xf32>
    %59 = vector.shape_cast %58 : vector<32xf32> to vector<1x32xf32>
    %60 = arith.addf %56, %59 : vector<1x32xf32>
    %61 = arith.divf %60, %55 : vector<1x32xf32>
    %c0_i32_23 = arith.constant 0 : i32
    %62 = arith.cmpi sgt, %23, %c0_i32_23 : i32
    %63 = arith.select %62, %61, %28 : vector<1x32xf32>
    %64 = math.tanh %63 : vector<1x32xf32>
    %65 = arith.mulf %18, %64 : vector<1x32xf32>
    %c0_24 = arith.constant 0 : index
    %c0_25 = arith.constant 0 : index
    %66 = vector.load %arg14[%c0_24, %c0_25] : memref<1x32xf32, #tpu.memory_space<vmem>>, vector<1x32xf32>
    tpu.vector_store %arg14[%c0_24, %c0_25], %65 {strides = array<i32>} : memref<1x32xf32, #tpu.memory_space<vmem>>, vector<1x32xf32>,
    %c0_26 = arith.constant 0 : index
    %c0_27 = arith.constant 0 : index
    %67 = vector.load %arg15[%c0_26, %c0_27] : memref<1x32xf32, #tpu.memory_space<vmem>>, vector<1x32xf32>
    tpu.vector_store %arg15[%c0_26, %c0_27], %63 {strides = array<i32>} : memref<1x32xf32, #tpu.memory_space<vmem>>, vector<1x32xf32>,
    %68 = arith.index_cast %arg0 : i32 to index
    %69 = memref.load %arg2[%68] : memref<8xi32, #tpu.memory_space<smem>>
    %c0_i32_28 = arith.constant 0 : i32
    %70 = arith.cmpi sgt, %69, %c0_i32_28 : i32
    %71 = arith.extui %70 : i1 to i32
    %c0_i32_29 = arith.constant 0 : i32
    %72 = arith.cmpi ne, %71, %c0_i32_29 : i32
    scf.if %72 {
      %c0_38 = arith.constant 0 : index
      %c0_39 = arith.constant 0 : index
      %c0_40 = arith.constant 0 : index
      %79 = vector.load %arg4[%c0_38, %c0_39, %c0_40] : memref<1x4x16xf32, #tpu.memory_space<vmem>>, vector<1x4x16xf32>
      %80 = vector.shape_cast %79 : vector<1x4x16xf32> to vector<4x16xf32>
      %81 = vector.shape_cast %65 : vector<1x32xf32> to vector<1x32xf32>
      %82 = vector.broadcast %81 : vector<1x32xf32> to vector<4x32xf32>
      %83 = tpu.concatenate %80, %82 in 1 : vector<4x16xf32>, vector<4x32xf32> -> vector<4x48xf32>
      %c0_41 = arith.constant 0 : index
      %c0_42 = arith.constant 0 : index
      %84 = vector.load %arg9[%c0_41, %c0_42] : memref<48x128xf32, #tpu.memory_space<vmem>>, vector<48x128xf32>
      %cst_43 = arith.constant dense<0.000000e+00> : vector<4x128xf32>
      %85 = tpu.matmul %83, %84, %cst_43 {dimension_numbers = #tpu.dot_dimension_numbers<[1], [0], [0], [1], [0, 0, 1, 1], [], []>} : vector<4x48xf32>, vector<48x128xf32>, vector<4x128xf32> -> vector<4x128xf32>
      %c0_44 = arith.constant 0 : index
      %c0_45 = arith.constant 0 : index
      %86 = vector.load %arg10[%c0_44, %c0_45] : memref<1x128xf32, #tpu.memory_space<vmem>>, vector<1x128xf32>
      %87 = vector.broadcast %86 : vector<1x128xf32> to vector<4x128xf32>
      %88 = arith.addf %85, %87 : vector<4x128xf32>
      %89 = arith.negf %88 : vector<4x128xf32>
      %90 = math.exp %89 : vector<4x128xf32>
      %cst_46 = arith.constant 1.000000e+00 : f32
      %91 = vector.broadcast %cst_46 : f32 to vector<4x128xf32>
      %92 = arith.addf %91, %90 : vector<4x128xf32>
      %93 = arith.divf %91, %92 : vector<4x128xf32>
      %94 = vector.extract_strided_slice %93 {offsets = [0, 0], sizes = [4, 32], strides = [1, 1]} : vector<4x128xf32> to vector<4x32xf32>
      %95 = vector.extract_strided_slice %93 {offsets = [0, 32], sizes = [4, 32], strides = [1, 1]} : vector<4x128xf32> to vector<4x32xf32>
      %96 = vector.extract_strided_slice %88 {offsets = [0, 64], sizes = [4, 32], strides = [1, 1]} : vector<4x128xf32> to vector<4x32xf32>
      %97 = math.tanh %96 : vector<4x32xf32>
      %98 = vector.broadcast %63 : vector<1x32xf32> to vector<4x32xf32>
      %99 = arith.mulf %94, %98 : vector<4x32xf32>
      %100 = arith.mulf %95, %97 : vector<4x32xf32>
      %101 = arith.addf %99, %100 : vector<4x32xf32>
      %c0_47 = arith.constant 0 : index
      %c0_48 = arith.constant 0 : index
      %c0_49 = arith.constant 0 : index
      %102 = vector.load %arg5[%c0_47, %c0_48, %c0_49] : memref<1x32x4xf32, #tpu.memory_space<vmem>>, vector<1x32x4xf32>
      %103 = vector.shape_cast %102 : vector<1x32x4xf32> to vector<32x4xf32>
      %cst_50 = arith.constant dense<0.000000e+00> : vector<32x32xf32>
      %104 = tpu.matmul %103, %101, %cst_50 {dimension_numbers = #tpu.dot_dimension_numbers<[1], [0], [0], [1], [0, 0, 1, 1], [], []>} : vector<32x4xf32>, vector<4x32xf32>, vector<32x32xf32> -> vector<32x32xf32>
      %c8_i32_51 = arith.constant 8 : i32
      %105 = arith.muli %arg0, %c8_i32_51 : i32
      %106 = tpu.assume_multiple %105, 8 : i32
      %107 = arith.index_cast %106 : i32 to index
      %c0_52 = arith.constant 0 : index
      %108 = vector.load %arg16[%107, %c0_52] : memref<96x32xf32, #tpu.memory_space<vmem>>, vector<32x32xf32>
      %109 = arith.addf %108, %104 : vector<32x32xf32>
      %110 = arith.index_cast %106 : i32 to index
      %c0_53 = arith.constant 0 : index
      %111 = vector.load %arg16[%110, %c0_53] : memref<96x32xf32, #tpu.memory_space<vmem>>, vector<32x32xf32>
      tpu.vector_store %arg16[%110, %c0_53], %109 {strides = array<i32>} : memref<96x32xf32, #tpu.memory_space<vmem>>, vector<32x32xf32>,
    } else {
    }
    %c0_30 = arith.constant 0 : index
    %c0_31 = arith.constant 0 : index
    %73 = vector.load %arg11[%c0_30, %c0_31] : memref<32x128xf32, #tpu.memory_space<vmem>>, vector<32x128xf32>
    %cst_32 = arith.constant dense<0.000000e+00> : vector<1x128xf32>
    %74 = tpu.matmul %65, %73, %cst_32 {dimension_numbers = #tpu.dot_dimension_numbers<[1], [0], [0], [1], [0, 0, 1, 1], [], []>} : vector<1x32xf32>, vector<32x128xf32>, vector<1x128xf32> -> vector<1x128xf32>
    %c0_33 = arith.constant 0 : index
    %c0_34 = arith.constant 0 : index
    %75 = vector.load %arg12[%c0_33, %c0_34] : memref<1x128xf32, #tpu.memory_space<vmem>>, vector<1x128xf32>
    %76 = arith.addf %74, %75 : vector<1x128xf32>
    %77 = vector.shape_cast %76 : vector<1x128xf32> to vector<1x1x128xf32>
    %c0_35 = arith.constant 0 : index
    %c0_36 = arith.constant 0 : index
    %c0_37 = arith.constant 0 : index
    %78 = vector.load %arg13[%c0_35, %c0_36, %c0_37] : memref<1x1x128xf32, #tpu.memory_space<vmem>>, vector<1x1x128xf32>
    tpu.vector_store %arg13[%c0_35, %c0_36, %c0_37], %77 {strides = array<i32>} : memref<1x1x128xf32, #tpu.memory_space<vmem>>, vector<1x1x128xf32>,
    return
  }
  func.func @transform_0(%arg0: i32) -> i32 {
    %c0_i32 = arith.constant 0 : i32
    %c0_i32_0 = arith.constant 0 : i32
    return %c0_i32 : i32
  }
  func.func @transform_1(%arg0: i32) -> i32 {
    %c0_i32 = arith.constant 0 : i32
    %c0_i32_0 = arith.constant 0 : i32
    return %c0_i32 : i32
  }
  func.func @transform_2(%arg0: i32) -> (i32, i32, i32) {
    %c0_i32 = arith.constant 0 : i32
    %c0_i32_0 = arith.constant 0 : i32
    %c0_i32_1 = arith.constant 0 : i32
    return %arg0, %c0_i32, %c0_i32_0 : i32, i32, i32
  }
  func.func @transform_3(%arg0: i32) -> (i32, i32, i32) {
    %c0_i32 = arith.constant 0 : i32
    %c0_i32_0 = arith.constant 0 : i32
    %c0_i32_1 = arith.constant 0 : i32
    return %arg0, %c0_i32, %c0_i32_0 : i32, i32, i32
  }
  func.func @transform_4(%arg0: i32) -> (i32, i32, i32) {
    %c0_i32 = arith.constant 0 : i32
    %c0_i32_0 = arith.constant 0 : i32
    %c0_i32_1 = arith.constant 0 : i32
    return %arg0, %c0_i32, %c0_i32_0 : i32, i32, i32
  }
  func.func @transform_5(%arg0: i32) -> (i32, i32) {
    %c0_i32 = arith.constant 0 : i32
    %c0_i32_0 = arith.constant 0 : i32
    %c0_i32_1 = arith.constant 0 : i32
    return %c0_i32, %c0_i32_0 : i32, i32
  }
  func.func @transform_6(%arg0: i32) -> (i32, i32) {
    %c0_i32 = arith.constant 0 : i32
    %c0_i32_0 = arith.constant 0 : i32
    %c0_i32_1 = arith.constant 0 : i32
    return %c0_i32, %c0_i32_0 : i32, i32
  }
  func.func @transform_7(%arg0: i32) -> (i32, i32) {
    %c0_i32 = arith.constant 0 : i32
    %c0_i32_0 = arith.constant 0 : i32
    %c0_i32_1 = arith.constant 0 : i32
    return %c0_i32, %c0_i32_0 : i32, i32
  }
  func.func @transform_8(%arg0: i32) -> (i32, i32) {
    %c0_i32 = arith.constant 0 : i32
    %c0_i32_0 = arith.constant 0 : i32
    %c0_i32_1 = arith.constant 0 : i32
    return %c0_i32, %c0_i32_0 : i32, i32
  }
  func.func @transform_9(%arg0: i32) -> (i32, i32) {
    %c0_i32 = arith.constant 0 : i32
    %c0_i32_0 = arith.constant 0 : i32
    %c0_i32_1 = arith.constant 0 : i32
    return %c0_i32, %c0_i32_0 : i32, i32
  }
  func.func @transform_10(%arg0: i32) -> (i32, i32) {
    %c0_i32 = arith.constant 0 : i32
    %c0_i32_0 = arith.constant 0 : i32
    %c0_i32_1 = arith.constant 0 : i32
    return %c0_i32, %c0_i32_0 : i32, i32
  }
  func.func @transform_11(%arg0: i32) -> (i32, i32) {
    %c0_i32 = arith.constant 0 : i32
    %c0_i32_0 = arith.constant 0 : i32
    %c0_i32_1 = arith.constant 0 : i32
    return %c0_i32, %c0_i32_0 : i32, i32
  }
  func.func @transform_12(%arg0: i32) -> (i32, i32, i32) {
    %c0_i32 = arith.constant 0 : i32
    %c0_i32_0 = arith.constant 0 : i32
    %c0_i32_1 = arith.constant 0 : i32
    return %arg0, %c0_i32, %c0_i32_0 : i32, i32, i32
  }
}

</mosaic_0001>

<bundles_post_ra>
// kernel: tpu_custom_call.1
= control target key start
LH: loop header
LB: loop body
LE: loop exit
PB: predicated region body
PF: predicated region fallthrough
CT: control target
= control target key end

     0   :  { %s1526_s0 = inlined_call_operand.vmem [shape: s32[8], index: 0, kind: input, shape index: {}]   ;;  %s1527_s1 = inlined_call_operand.vmem [shape: s32[8], index: 1, kind: input, shape index: {}]   ;;  %s1528_s2 = inlined_call_operand.vmem [shape: f32[8,1,16], index: 2, kind: input, shape index: {}]   ;;  %s1529_s3 = inlined_call_operand.vmem [shape: f32[8,4,16], index: 3, kind: input, shape index: {}]   ;;  %s1530_s4 = inlined_call_operand.vmem [shape: f32[8,32,4], index: 4, kind: input, shape index: {}]   ;;  %s1531_s5 = inlined_call_operand.vmem [shape: f32[48,128], index: 5, kind: input, shape index: {}]   ;;  %s1532_s6 = inlined_call_operand.vmem [shape: f32[1,128], index: 6, kind: input, shape index: {}]   ;;  %s1533_s7 = inlined_call_operand.vmem [shape: f32[32,32], index: 7, kind: input, shape index: {}]   ;;  %s1534_s8 = inlined_call_operand.vmem [shape: f32[48,128], index: 8, kind: input, shape index: {}]   ;;  %s1535_s9 = inlined_call_operand.vmem [shape: f32[1,128], index: 9, kind: input, shape index: {}]   ;;  %s1536_s10 = inlined_call_operand.vmem [shape: f32[32,128], index: 10, kind: input, shape index: {}]   ;;  %s1537_s11 = inlined_call_operand.vmem [shape: f32[1,128], index: 11, kind: input, shape index: {}]   ;;  %s1538_s12 = inlined_call_operand.hbm [shape: f32[8,1,128], index: 12, kind: output, shape index: {}]  }
   0x1   :  { %1542 = sst [smem:[#allocation17_spill]] %s1526_s0 }
   0x2   :  { %1543 = sst [smem:[#allocation18_spill]] %s1527_s1 }
   0x3   :  { %1544 = sst [smem:[#allocation19_spill]] %s1529_s3 }
   0x4   :  { %1545 = sst [smem:[#allocation20_spill]] %s1530_s4 }
   0x5   :  { %17 = vsyncpa [#allocation7], 0 }
   0x6   :  { %18 = vsyncpa [#allocation9], 0 }
   0x7   :  { %19 = vsyncpa [#allocation6], 0 }
   0x8   :  { %21 = vsyncpa [#allocation6 + $0x1], 0  ;;  %s1268_s21 = smov 0   ;;  %s1270_s22 = smov 0  }
   0x9   :  { %s1272_s23 = smov 0   ;;  %s1274_s24 = smov 0  }
   0xa LB: > { %1546 = sst [smem:[#allocation14_spill]] %s1188_s23  ;;  %s1289_s25 = sadd.s32 4294967295, %s1192_s24   ;;  %s1192_s24 = sphi %s1274_s24, %s1560_s24   ;;  %s1188_s23 = sphi %s1272_s23, %s1562_s23   ;;  %s1184_s22 = sphi %s1270_s22, %s1564_s22   ;;  %s1180_s21 = sphi %s1268_s21, %s1563_s21  }
   0xb   : > { %s969_s26 = sadd.s32 4294967294, %s1192_s24   ;;  %s1293_s27 = sadd.s32 1, %s1192_s24  }
   0xc   : > { %1547 = sst [smem:[#allocation15_spill]] %s1293_s27  ;;  %s301_s28 = sadd.s32 1, %s1188_s23 }
   0xd   : > { %s298_s29 = ssub.s32 %s1192_s24, %s1293_s27  ;;  %p311_p0 = scmp.ne.s32.totalorder %s1188_s23, %s1184_s22 }
   0xe   : > { %p299_p1 = scmp.eq.s32.totalorder %s298_s29, 0  ;;  %p312_p2 = scmp.eq.s32.totalorder %s1289_s25, 7 }
   0xf   : > { %p317_p3 = scmp.ne.s32.totalorder %s1184_s22, %s1180_s21  ;;  %p318_p4 = scmp.eq.s32.totalorder %s969_s26, 7 }
  0x10   : > { %s1304_s30 = scalar_select %p299_p1, %s1188_s23, %s301_s28  }
  0x11   : > { %p1306_p5 = por %p312_p2, %p311_p0  ;;  %p1310_p6 = por %p318_p4, %p317_p3 }
  0x12   : > { %1548 = sst [smem:[#allocation16_spill]] %s1304_s30  ;;  %p970_p7 = scmp.ge.s32.totalorder %s1192_s24, 1 }
  0x13   : > { %p325_p8 = scmp.lt.s32.totalorder %s1192_s24, 9  ;;  %p971_p9 = scmp.ne.s32.totalorder %s1289_s25, 0 }
  0x14   : > { %p1020_p10 = scmp.eq.s32.totalorder %s1289_s25, 0  ;;  %s1551_s0 = sld [smem:[#allocation17_spill]] }
  0x15   : > { %p326_p11 = pnand %p970_p7, %p325_p8  ;;  %s1552_s1 = sld [smem:[#allocation18_spill]] }
  0x16   : > { %s1194_s26 = smov [#allocation5]   ;;  %s1195_s28 = smov [#allocation8]  }
  0x17   : > { %p1009_p12 = pneg %p326_p11 }
  0x19   : > { %p1010_p13 = pnand %p1020_p10, %p1009_p12  ;;  %402 = sbr.rel (%p326_p11) target bundleno = 1510 (0x5e6), region = 68 }
  0x1a   : > { %s337_s17 = sshll.u32 %s1551_s0, 4  ;;  %s338_s17 = int_to_ptr.vmem [resolvable:$true] %s337_s17 }
  0x1b   : > { %s347_s20 = sshll.u32 %s1552_s1, 4  ;;  %s348_s20 = int_to_ptr.vmem [resolvable:$true] %s347_s20 }
  0x1c   : > { %1012 = dma.vmem_to_smem (!%p1010_p13), %s338_s17, 16, %s1194_s26, [#allocation7]  }
  0x1d   : > { %1015 = dma.vmem_to_smem (!%p1010_p13), %s348_s20, 16, %s1195_s28, [#allocation9]  }
  0x1e   : > { %1167 = dma.done.wait (%p1020_p10), [#allocation7], 16  }
  0x1f   : > { %1169 = vsyncadd (%p1020_p10), [#allocation7], 4294967280 }
  0x20   : > { %1171 = dma.done.wait (%p1020_p10), [#allocation9], 16  }
  0x21   : > { %1173 = vsyncadd (%p1020_p10), [#allocation9], 4294967280 }
  0x22   : > { %414 = sfence }
  0x23   : > { %p457_p0 = scmp.lt.s32.totalorder %s1289_s25, 7  ;;  %s1553_s3 = sld [smem:[#allocation19_spill]] }
  0x24   : > { %s1554_s4 = sld [smem:[#allocation20_spill]]  ;;  %s1555_s23 = sand.u32 1, %s1184_s22  }
  0x25   : > { %s1337_s15 = scalar_select %p457_p0, %s1289_s25, 7 }
  0x26   : > { %s1357_s27 = scalar_lea.vmem [#allocation10], %s1555_s23  ;;  %472 = sbr.rel (%p971_p9) target bundleno = 58 (0x3a), region = 80 }
  0x27   : > { %s977_s19 = sshll.u32 %s1337_s15, 2  ;;  %s997_s0 = sshll.u32 %s1337_s15, 5 }
  0x29   : > { %s1347_s28 = scalar_lea.vmem %s1553_s3, %s977_s19 }
  0x2a   : > { %s1353_s29 = scalar_lea.vmem %s1554_s4, %s997_s0 }
  0x2b   : > { %vm473_vm0 = vcmask 253952   ;;  %vm476_vm1 = vcmask 261120   ;;  %v1196_v0 = vmov 0.0  }
  0x2c   : > { %474 = vst.msk [vmem:[#allocation2] sm:$0x1] %vm473_vm0, %v1196_v0 }
  0x2d   : > { %475 = vst.msk [vmem:[#allocation3] sm:$0x1] %vm473_vm0, %v1196_v0 }
  0x2e   : > { %477 = vst.msk [vmem:[#allocation4] sm:$0xff] %vm476_vm1, %v1196_v0 }
  0x2f   : > { %478 = vst.msk [vmem:[#allocation4 + $0x8] sm:$0xff] %vm476_vm1, %v1196_v0 }
  0x30   : > { %479 = vst.msk [vmem:[#allocation4 + $0x10] sm:$0xff] %vm476_vm1, %v1196_v0 }
  0x31   : > { %480 = vst.msk [vmem:[#allocation4 + $0x18] sm:$0xff] %vm476_vm1, %v1196_v0 }
  0x32   : > { %481 = vst.msk [vmem:[#allocation4 + $0x20] sm:$0xff] %vm476_vm1, %v1196_v0 }
  0x33   : > { %482 = vst.msk [vmem:[#allocation4 + $0x28] sm:$0xff] %vm476_vm1, %v1196_v0 }
  0x34   : > { %483 = vst.msk [vmem:[#allocation4 + $0x30] sm:$0xff] %vm476_vm1, %v1196_v0 }
  0x35   : > { %484 = vst.msk [vmem:[#allocation4 + $0x38] sm:$0xff] %vm476_vm1, %v1196_v0 }
  0x36   : > { %485 = vst.msk [vmem:[#allocation4 + $0x40] sm:$0xff] %vm476_vm1, %v1196_v0 }
  0x37   : > { %486 = vst.msk [vmem:[#allocation4 + $0x48] sm:$0xff] %vm476_vm1, %v1196_v0 }
  0x38   : > { %487 = vst.msk [vmem:[#allocation4 + $0x50] sm:$0xff] %vm476_vm1, %v1196_v0 }
  0x39   : > { %488 = vst.msk [vmem:[#allocation4 + $0x58] sm:$0xff] %vm476_vm1, %v1196_v0 }
  0x3a PF: > { %v570_v1 = vld [vmem:[%s1533_s7 + $0x18] sm:$0xff]  ;;  %v1066_v2 = vld [vmem:[#allocation2] ss:$0 sm:$0xff]  ;;  %v562_v3 = vlaneseq  ;;  %v569_v4 = vld [vmem:[%s1533_s7 + $0x10] sm:$0xff]  ;;  %s1368_s16 = sld [smem:[#allocation5 + %s1289_s25]]  ;;  %s983_s17 = sshll.u32 %s1289_s25, 3 }
  0x3b   : > { %587 = vmatpush.msra.mxu1 %v570_v1  ;;  %s1197_s19 = smov 16   ;;  %v568_v5 = vld [vmem:[%s1533_s7 + $0x8] sm:$0xff]  ;;  %v503_v7 = vld [vmem:[%s1531_s5 + $0x20] sm:$0xff]  ;;  %v502_v10 = vld [vmem:[%s1531_s5 + $0x18] sm:$0xff]  ;;  %s1386_s20 = scalar_lea.vmem [#allocation4], %s983_s17  ;;  %vm571_vm2 = vcmask 261120  }
  0x3c   : > { %494 = vrot.lane.b32.xlu0 %v1066_v2, %s1197_s19  ;;  %v504_v6 = vld [vmem:[%s1531_s5 + $0x28] sm:$0xff]  ;;  %v567_v8 = vld [vmem:[%s1533_s7] sm:$0xff]  ;;  %v563_v9 = vshrl.u32 %v562_v3, 7  ;;  %v501_v12 = vld [vmem:[%s1531_s5 + $0x10] sm:$0xff]  ;;  %s1198_s17 = smov 96   ;;  %s1558_s19 = scalar_lea.vmem %s1528_s2, %s1337_s15  ;;  %vm497_vm4 = vcmask 130048  }
  0x3d   : > { %588 = vmatpush.msra.mxu1 %v569_v4  ;;  %520 = vmatpush.msra.mxu0 %v504_v6  ;;  %v500_v15 = vld [vmem:[%s1531_s5 + $0x8] sm:$0xff]  ;;  %v499_v17 = vld [vmem:[%s1531_s5] sm:$0xff]  ;;  %vm506_vm5 = vcmask 392192   ;;  %s1199_s15 = smov 64   ;;  %vm625_vm10 = vcmask 1048320   ;;  %s1200_s4 = smov 32  }
  0x3e   : > { %v489_v18 = vld [vmem:[%s1558_s19] sm:$0x1] }
  0x3f   : > { %589 = vmatpush.msra.mxu1 %v568_v5  ;;  %521 = vmatpush.msra.mxu0 %v503_v7  ;;  %v505_v22 = vld [vmem:[%s1532_s6] sm:$0x1] }
  0x40   : > { %v561_v11 = vld [vmem:[%s1386_s20] sm:$0xff]  ;;  %v564_v13 = vstv %s1368_s16  ;;  %p671_p1 = scmp.gt.s32.totalorder %s1368_s16, 0  ;;  %s689_s16 = sld [smem:[#allocation8 + %s1289_s25]] }
  0x41   : > { %590 = vmatpush.msra.mxu1 %v567_v8  ;;  %522 = vmatpush.msra.mxu0 %v502_v10  ;;  %vm1393_vm3 = vcmp.lt.s32.totalorder %v563_v9, %v564_v13 }
  0x42   : > { %v566_v16 = vsel %vm1393_vm3, %v561_v11, 0.0  ;;  %s672_s18 = scalar_select %p671_p1, 1, 0 }
  0x43   : > { %523 = vmatpush.msra.mxu0 %v501_v12  ;;  %984 = vmatmul.msk.f32.vlgmr.msra.gmra.mxu1 %vm571_vm2, %v566_v16 }
  0x44   : > { %640 = vrot.lane.b32.xlu1 %v566_v16, %s1198_s17 }
  0x45   : > { %524 = vmatpush.msra.mxu0 %v500_v15 }
  0x46   : > { %p986_p2 = scmp.le.s32.totalorder %s689_s16, 0 }
  0x47   : > { %525 = vmatpush.msra.mxu0 %v499_v17  ;;  %s1201_s19 = smov (!%p986_p2), 112   ;;  %s1202_s30 = smov (!%p986_p2), 96  }
  0xae   : > { %v495_v19 = vpop.permute.xlu0 %494 }
  0xaf   : > { %v498_v20 = vsel %vm497_vm4, %v489_v18, %v495_v19 }
  0xb0   : > { %981 = vmatmul.msk.f32.vlgmr.msra.gmra.mxu0 %vm506_vm5, %v498_v20 }
  0xb6   : > { %v641_v43 = vpop.permute.xlu1 %640 }
  0xc0   : > { %v592_v21 = vpop.f32.mrf.mxu1 }
  0xc1   : > { %597 = vrot.lane.b32.xlu0 %v592_v21, %s1198_s17 }
 0x12d   : > { %v527_v23 = vpop.f32.mrf.mxu0 }
 0x12e   : > { %v528_v24 = vadd.f32 %v527_v23, %v505_v22  ;;  %v673_v23 = vstv %s672_s18 }
 0x130   : > { %1067 = vtanh.f32 %v528_v24  ;;  %v595_v25 = vperm.slane %v528_v24, 0  ;;  %v982_v61 = vmul.f32 -1.442695, %v528_v24  ;;  %v491_v24 = vld [vmem:[#allocation3] sm:$0x1] }
 0x133   : > { %v598_v26 = vpop.permute.xlu0 %597 }
 0x134   : > { %v600_v27 = vadd.f32 %v598_v26, %v595_v25 }
 0x136   : > { %v1068_v28 = vpop.eup %1067  ;;  %v985_v29 = vmul.f32 -1.442695, %v600_v27 }
 0x137   : > { %554 = vrot.lane.b32.xlu2 %v1068_v28, %s1199_s15 }
 0x138   : > { %1069 = vpow2.f32 %v985_v29 }
 0x13e   : > { %v1070_v30 = vpop.eup %1069 }
 0x13f   : > { %v604_v31 = vadd.f32 1.0, %v1070_v30 }
 0x141   : > { %1071 = vrcp.f32 %v604_v31  ;;  %v616_v35 = vand.u32 2147483648, %v604_v31  ;;  %v614_v37 = vand.u32 2147483647, %v604_v31  ;;  %vm610_vm7 = vweird.f32 %v604_v31 }
 0x143   : > { %v617_v39 = vor.u32 1.1754944e-38, %v616_v35  ;;  %vm615_vm9 = vcmp.eq.f32.partialorder %v614_v37, 8.507059e+37 }
 0x147   : > { %v1072_v32 = vpop.eup %1071 }
 0x148   : > { %v606_v33 = vmul.f32 %v1072_v32, %v604_v31  ;;  %vm611_vm6 = vweird.f32 %v1072_v32 }
 0x149   : > { %vm612_vm8 = vmor %vm610_vm7, %vm611_vm6  ;;  %vm674_vm6 = vcmp.eq.s32.totalorder %v673_v23, 1  ;;  %vm686_vm7 = vcmask 253952  }
 0x14a   : > { %v607_v34 = vsub.f32 1.0, %v606_v33 }
 0x14c   : > { %v608_v36 = vmul.f32 %v1072_v32, %v607_v34 }
 0x14e   : > { %v609_v38 = vadd.f32 %v1072_v32, %v608_v36 }
 0x150   : > { %v613_v40 = vsel %vm612_vm8, %v1072_v32, %v609_v38 }
 0x151   : > { %v618_v41 = vsel %vm615_vm9, %v617_v39, %v613_v40 }
 0x152   : > { %v620_v42 = vmul.f32 1.442695, %v618_v41 }
 0x154   : > { %1073 = vpow2.f32 %v620_v42 }
 0x155   : > { %1075 = vpow2.f32 %v982_v61 }
 0x15a   : > { %v1074_v44 = vpop.eup %1073 }
 0x15b   : > { %v622_v45 = vsel %vm1393_vm3, %v1074_v44, 0.0  ;;  %v1076_v62 = vpop.eup %1075 }
 0x15c   : > { %v626_v46 = vsel %vm625_vm10, %v622_v45, 0.0  ;;  %v643_v47 = vmul.f32 %v641_v43, %v622_v45  ;;  %v533_v63 = vadd.f32 1.0, %v1076_v62 }
 0x15d   : > { %v627_v48 = vrot.slane %v626_v46, 4 }
 0x15e   : > { %v644_v49 = vsel %vm625_vm10, %v643_v47, 0.0  ;;  %1077 = vrcp.f32 %v533_v63  ;;  %v545_v5 = vand.u32 2147483648, %v533_v63  ;;  %vm539_vm12 = vweird.f32 %v533_v63 }
 0x15f   : > { %v628_v50 = vadd.f32 %v627_v48, %v626_v46  ;;  %v645_v51 = vrot.slane %v644_v49, 4  ;;  %v543_v6 = vand.u32 2147483647, %v533_v63 }
 0x160   : > { %v546_v8 = vor.u32 1.1754944e-38, %v545_v5 }
 0x161   : > { %v629_v52 = vrot.slane %v628_v50, 2  ;;  %v646_v53 = vadd.f32 %v645_v51, %v644_v49  ;;  %vm544_vm14 = vcmp.eq.f32.partialorder %v543_v6, 8.507059e+37 }
 0x163   : > { %v630_v54 = vadd.f32 %v629_v52, %v628_v50  ;;  %v647_v55 = vrot.slane %v646_v53, 2 }
 0x164   : > { %v1078_v0 = vpop.eup %1077 }
 0x165   : > { %v648_v56 = vadd.f32 %v647_v55, %v646_v53  ;;  %v631_v57 = vrot.slane %v630_v54, 1  ;;  %v535_v1 = vmul.f32 %v1078_v0, %v533_v63  ;;  %vm540_vm11 = vweird.f32 %v1078_v0 }
 0x166   : > { %vm541_vm13 = vmor %vm539_vm12, %vm540_vm11 }
 0x167   : > { %v632_v58 = vadd.f32 %v631_v57, %v630_v54  ;;  %v649_v59 = vrot.slane %v648_v56, 1  ;;  %v536_v2 = vsub.f32 1.0, %v535_v1 }
 0x169   : > { %634 = vrot.lane.b32.xlu1 %v632_v58, %s1200_s4  ;;  %v650_v60 = vadd.f32 %v649_v59, %v648_v56  ;;  %v537_v3 = vmul.f32 %v1078_v0, %v536_v2 }
 0x16b   : > { %652 = vrot.lane.b32.xlu2 %v650_v60, %s1200_s4  ;;  %v538_v4 = vadd.f32 %v1078_v0, %v537_v3 }
 0x16d   : > { %v542_v7 = vsel %vm541_vm13, %v1078_v0, %v538_v4 }
 0x16e   : > { %v547_v9 = vsel %vm544_vm14, %v546_v8, %v542_v7 }
 0x16f   : > { %v623_v10 = vmul.f32 1.442695, %v547_v9  ;;  %v551_v20 = vsub.f32 1.0, %v547_v9 }
 0x171   : > { %1079 = vpow2.f32 %v623_v10  ;;  %v552_v30 = vmul.f32 %v551_v20, %v491_v24 }
 0x177   : > { %v1080_v11 = vpop.eup %1079 }
 0x191   : > { %v555_v15 = vpop.permute.xlu2 %554 }
 0x192   : > { %v557_v26 = vmul.f32 %v555_v15, %v547_v9  ;;  %v639_v27 = vmul.f32 %v1080_v11, %v555_v15 }
 0x194   : > { %v558_v34 = vadd.f32 %v557_v26, %v552_v30 }
 0x1c5   : > { %v653_v25 = vpop.permute.xlu2 %652 }
 0x1c6   : > { %v655_v31 = vadd.f32 %v653_v25, %v639_v27 }
 0x1db   : > { %v635_v12 = vpop.permute.xlu1 %634 }
 0x1dc   : > { %v637_v13 = vadd.f32 %v1080_v11, %v635_v12 }
 0x1de   : > { %v638_v14 = vadd.f32 1e-12, %v637_v13 }
 0x1e0   : > { %1081 = vrcp.f32 %v638_v14  ;;  %v667_v19 = vand.u32 2147483648, %v638_v14  ;;  %v665_v22 = vand.u32 2147483647, %v638_v14  ;;  %vm661_vm0 = vweird.f32 %v638_v14 }
 0x1e2   : > { %v668_v29 = vor.u32 1.1754944e-38, %v667_v19  ;;  %vm666_vm3 = vcmp.eq.f32.partialorder %v665_v22, 8.507059e+37 }
 0x1e6   : > { %v1082_v16 = vpop.eup %1081 }
 0x1e7   : > { %v657_v17 = vmul.f32 %v1082_v16, %v638_v14  ;;  %vm662_vm15 = vweird.f32 %v1082_v16 }
 0x1e8   : > { %vm663_vm1 = vmor %vm661_vm0, %vm662_vm15 }
 0x1e9   : > { %v658_v18 = vsub.f32 1.0, %v657_v17 }
 0x1eb   : > { %v659_v21 = vmul.f32 %v1082_v16, %v658_v18 }
 0x1ed   : > { %v660_v28 = vadd.f32 %v1082_v16, %v659_v21 }
 0x1ef   : > { %v664_v32 = vsel %vm663_vm1, %v1082_v16, %v660_v28 }
 0x1f0   : > { %v669_v33 = vsel %vm666_vm3, %v668_v29, %v664_v32 }
 0x1f1   : > { %v670_v35 = vmul.f32 %v669_v33, %v655_v31 }
 0x1f3   : > { %v1423_v36 = vsel %vm674_vm6, %v670_v35, %v558_v34 }
 0x1f4   : > { %1083 = vtanh.f32 %v1423_v36  ;;  %688 = vst.msk [vmem:[#allocation3] sm:$0x1] %vm686_vm7, %v1423_v36 }
 0x1fa   : > { %v1084_v37 = vpop.eup %1083 }
 0x1fb   : > { %678 = vrot.lane.b32.xlu0 %v1084_v37, %s1200_s4 }
 0x26d   : > { %v679_v38 = vpop.permute.xlu0 %678 }
 0x26e   : > { %v681_v39 = vmul.f32 %v679_v38, %v547_v9 }
 0x270   : > { %683 = vrot.lane.b32.xlu1 %v681_v39, %s1198_s17 }
 0x2df   : > { %693 = sbr.rel (%p986_p2) target bundleno = 1371 (0x55b), region = 84 }
 0x2e2   : > { %v1430_v40 = vpop.permute.xlu1 %683 }
 0x2e3   : > { %687 = vst.msk [vmem:[#allocation2] sm:$0x1] %vm686_vm7, %v1430_v40 }
 0x2e4   : > { %v695_v41 = vperm.slane %v681_v39, 0  ;;  %v706_v42 = vld [vmem:[%s1534_s8 + $0x28] sm:$0xff]  ;;  %v705_v43 = vld [vmem:[%s1534_s8 + $0x20] sm:$0xff]  ;;  %v704_v44 = vld [vmem:[%s1534_s8 + $0x18] sm:$0xff]  ;;  %v754_v6 = vperm.slane %v1423_v36, 0  ;;  %vm783_vm10 = vcmask 1043456  }
 0x2e5   : > { %724 = vmatpush.msra.mxu0 %v706_v42  ;;  %v703_v45 = vld [vmem:[%s1534_s8 + $0x10] sm:$0xff]  ;;  %v702_v46 = vld [vmem:[%s1534_s8 + $0x8] sm:$0xff]  ;;  %v701_v47 = vld [vmem:[%s1534_s8] sm:$0xff]  ;;  %vm770_vm11 = vcmask 31744  }
 0x2e6   : > { %697 = vrot.lane.b32.xlu0 %v695_v41, %s1201_s19  ;;  %v694_v48 = vld [vmem:[%s1347_s28] sm:$0xf]  ;;  %v768_v10 = vld [vmem:[%s1353_s29 + $0x10] sm:$0xff]  ;;  %v769_v12 = vld [vmem:[%s1353_s29 + $0x18] sm:$0xff] }
 0x2e7   : > { %725 = vmatpush.msra.mxu0 %v705_v43  ;;  %v1085_v51 = vld [vmem:[%s1535_s9] ss:$0 sm:$0xff]  ;;  %v767_v13 = vld [vmem:[%s1353_s29 + $0x8] sm:$0xff]  ;;  %v818_v17 = vld [vmem:[%s1386_s20 + $0x10] sm:$0xff] }
 0x2e8   : > { %v766_v11 = vld [vmem:[%s1353_s29] sm:$0xff]  ;;  %v817_v19 = vld [vmem:[%s1386_s20 + $0x8] sm:$0xff]  ;;  %v819_v23 = vld [vmem:[%s1386_s20 + $0x18] sm:$0xff] }
 0x2e9   : > { %726 = vmatpush.msra.mxu0 %v704_v44  ;;  %v816_v14 = vld [vmem:[%s1386_s20] sm:$0xff] }
 0x2eb   : > { %727 = vmatpush.msra.mxu0 %v703_v45 }
 0x2ed   : > { %728 = vmatpush.msra.mxu0 %v702_v46 }
 0x2ef   : > { %729 = vmatpush.msra.mxu0 %v701_v47 }
 0x358   : > { %v698_v49 = vpop.permute.xlu0 %697 }
 0x359   : > { %v700_v50 = vsel %vm497_vm4, %v694_v48, %v698_v49 }
 0x35a   : > { %987 = vmatmul.msk.f32.vlgmr.msra.gmra.mxu0 %vm506_vm5, %v700_v50 }
 0x3d7   : > { %v731_v52 = vpop.f32.mrf.mxu0 }
 0x3d8   : > { %v732_v53 = vadd.f32 %v1085_v51, %v731_v52 }
 0x3da   : > { %1086 = vtanh.f32 %v732_v53  ;;  %v988_v55 = vmul.f32 -1.442695, %v732_v53 }
 0x3dc   : > { %1088 = vpow2.f32 %v988_v55 }
 0x3e0   : > { %v1087_v54 = vpop.eup %1086 }
 0x3e1   : > { %757 = vrot.lane.b32.xlu0 %v1087_v54, %s1202_s30 }
 0x3e2   : > { %v1089_v56 = vpop.eup %1088 }
 0x3e3   : > { %v737_v57 = vadd.f32 1.0, %v1089_v56 }
 0x3e5   : > { %1090 = vrcp.f32 %v737_v57  ;;  %v749_v63 = vand.u32 2147483648, %v737_v57  ;;  %vm743_vm5 = vweird.f32 %v737_v57  ;;  %v747_v0 = vand.u32 2147483647, %v737_v57 }
 0x3e7   : > { %v750_v2 = vor.u32 1.1754944e-38, %v749_v63  ;;  %vm748_vm9 = vcmp.eq.f32.partialorder %v747_v0, 8.507059e+37 }
 0x3eb   : > { %v1091_v58 = vpop.eup %1090 }
 0x3ec   : > { %v739_v59 = vmul.f32 %v1091_v58, %v737_v57  ;;  %vm744_vm4 = vweird.f32 %v1091_v58 }
 0x3ed   : > { %vm745_vm8 = vmor %vm743_vm5, %vm744_vm4 }
 0x3ee   : > { %v740_v60 = vsub.f32 1.0, %v739_v59 }
 0x3f0   : > { %v741_v61 = vmul.f32 %v1091_v58, %v740_v60 }
 0x3f2   : > { %v742_v62 = vadd.f32 %v1091_v58, %v741_v61 }
 0x3f4   : > { %v746_v1 = vsel %vm745_vm8, %v1091_v58, %v742_v62 }
 0x3f5   : > { %v751_v4 = vsel %vm748_vm9, %v750_v2, %v746_v1 }
 0x3f6   : > { %v755_v7 = vmul.f32 %v754_v6, %v751_v4 }
 0x453   : > { %v758_v3 = vpop.permute.xlu0 %757 }
 0x454   : > { %v760_v5 = vmul.f32 %v758_v3, %v751_v4 }
 0x456   : > { %762 = vrot.lane.b32.xlu1 %v760_v5, %s1202_s30 }
 0x4c8   : > { %v763_v8 = vpop.permute.xlu1 %762 }
 0x4c9   : > { %v765_v9 = vadd.f32 %v763_v8, %v755_v7 }
 0x4cb   : > { %989 = vmatpush.msk.msra.mxu1 %vm783_vm10, %v765_v9  ;;  %998 = vmatpush.msk.msra.mxu2 %vm783_vm10, %v765_v9 }
 0x4cc   : > { %992 = vmatmul.msk.f32.vlgmr.msra.gmra.mxu2 %vm770_vm11, %v768_v10  ;;  %990 = vmatmul.msk.f32.vlgmr.msra.gmra.mxu1 %vm770_vm11, %v766_v11 }
 0x4d4   : > { %993 = vmatmul.msk.f32.gmra.mxu2 %vm770_vm11, %v769_v12  ;;  %991 = vmatmul.msk.f32.gmra.mxu1 %vm770_vm11, %v767_v13 }
 0x549   : > { %v804_v15 = vpop.f32.mrf.mxu1 }
 0x54a   : > { %v820_v16 = vadd.f32 %v816_v14, %v804_v15 }
 0x54c   : > { %824 = vst.msk [vmem:[%s1386_s20] sm:$0xff] %vm571_vm2, %v820_v16 }
 0x54f   : > { %v810_v18 = vpop.f32.mrf.mxu2 }
 0x550   : > { %v822_v20 = vadd.f32 %v818_v17, %v810_v18 }
 0x551   : > { %v807_v21 = vpop.f32.mrf.mxu1 }
 0x552   : > { %826 = vst.msk [vmem:[%s1386_s20 + $0x10] sm:$0xff] %vm571_vm2, %v822_v20  ;;  %v821_v22 = vadd.f32 %v817_v19, %v807_v21 }
 0x554   : > { %825 = vst.msk [vmem:[%s1386_s20 + $0x8] sm:$0xff] %vm571_vm2, %v821_v22 }
 0x557   : > { %v813_v24 = vpop.f32.mrf.mxu2 }
 0x558   : > { %v823_v25 = vadd.f32 %v819_v23, %v813_v24 }
 0x55a   : > { %827 = vst.msk [vmem:[%s1386_s20 + $0x18] sm:$0xff] %vm571_vm2, %v823_v25 }
 0x55b PF: > { %v831_v26 = vld [vmem:[%s1536_s10 + $0x18] sm:$0xff]  ;;  %v830_v27 = vld [vmem:[%s1536_s10 + $0x10] sm:$0xff]  ;;  %v829_v28 = vld [vmem:[%s1536_s10 + $0x8] sm:$0xff]  ;;  %s865_s16 = scalar_lea.hbm %s1538_s12, %s1289_s25  ;;  %s867_s23 = sshll.u32 %s1357_s27, 4  ;;  %s868_s23 = int_to_ptr.vmem [resolvable:$true] %s867_s23 }
 0x55c   : > { %847 = vmatpush.msra.mxu0 %v831_v26  ;;  %v828_v29 = vld [vmem:[%s1536_s10] sm:$0xff]  ;;  %s869_s30 = sshll.u32 %s865_s16, 4  ;;  %s1559_s29 = sand.u32 1, %s1184_s22   ;;  %s870_s30 = int_to_ptr.hbm [resolvable:$true] %s869_s30 }
 0x55d   : > { %v832_v30 = vld [vmem:[%s1537_s11] sm:$0x1]  ;;  %s857_s28 = scalar_lea.sflag [#allocation6], %s1559_s29  ;;  %s1136_s19 = sshra.s32 %s870_s30, 4  ;;  %s1137_s19 = int_to_ptr.hbm [resolvable:$true] %s1136_s19 }
 0x55e   : > { %848 = vmatpush.msra.mxu0 %v830_v27  ;;  %s1138_s17 = scalar_lea.hbm %s1137_s19, 1  ;;  %s1142_s3 = scalar_lea.hbm %s1538_s12, 8 }
 0x55f   : > { %p1139_p3 = scmp.ne.s32.totalorder %s1137_s19, %s1138_s17  ;;  %p1143_p8 = scmp.lt.s32.totalorder %s1137_s19, %s1538_s12 }
 0x560   : > { %849 = vmatpush.msra.mxu0 %v829_v28  ;;  %p1144_p9 = scmp.lt.s32.totalorder %s1142_s3, %s1138_s17 }
 0x561   : > { %p1140_p4 = pnand %p1139_p3, %p1306_p5 }
 0x562   : > { %850 = vmatpush.msra.mxu0 %v828_v29  ;;  %p1145_p10 = por %p1144_p9, %p1143_p8 }
 0x563   : > { %994 = vmatmul.msk.f32.vlgmr.msra.gmra.mxu0 %vm571_vm2, %v1430_v40  ;;  %p1141_p7 = pneg %p1140_p4 }
 0x565   : > { %p1146_p11 = pnand %p1145_p10, %p1141_p7 }
 0x5e0   : > { %v852_v31 = vpop.f32.mrf.mxu0 }
 0x5e1   : > { %v853_v32 = vadd.f32 %v852_v31, %v832_v30 }
 0x5e3   : > { %855 = vst [vmem:[%s1357_s27] sm:$0x1] %v853_v32 }
 0x5e4   : > { %1149 = shalt.err (!%p1146_p11)
}
 0x5e5   : > { %1007 = dma.vmem_to_hbm [thread:$0]  (%p1306_p5), %s868_s23, 16, %s870_s30, %s857_s28  }
 0x5e6 PF: > { %p1024_p12 = scmp.ge.s32.totalorder %s1192_s24, 2  ;;  %s881_s27 = sand.u32 1, %s1180_s21  }
 0x5e7   : > { %s882_s4 = scalar_lea.sflag [#allocation6], %s881_s27 }
 0x5e8   : > { %p1017_p13 = pnand %p1024_p12, %p1310_p6 }
 0x5ea   : > { %p1018_p0 = pneg %p1017_p13 }
 0x5ec   : > { %1175 = dma.done.wait (%p1018_p0), %s882_s4, 16  }
 0x5ed   : > { %1177 = vsyncadd (%p1018_p0), %s882_s4, 4294967280  ;;  %s1560_s24 = sld [smem:[#allocation15_spill]]  ;;  %s1563_s21 = smov %s1184_s22 }
 0x5ee   : > { %s1561_s18 = sld [smem:[#allocation14_spill]] }
 0x5ef   : > { %s1562_s23 = sld [smem:[#allocation16_spill]] }
 0x5f3   : > { %p24_p1 = scmp.ge.s32.totalorder %s1560_s24, 10  }
 0x5f4   : > { %s1564_s22 = smov %s1561_s18 }
 0x5f5   :  { %26 = sbr.rel (!%p24_p1) target bundleno = 10 (0xa), region = 127 }
 0x5fa   :  { %887 = vsyncpa [#allocation6], 1 }
 0x5fb   :  { %889 = vsyncpa [#allocation6 + $0x1], 1 }
 0x5fc   :  { %890 = vsyncpa [#allocation7], 1 }
 0x5fd   :  { %892 = vsyncpa [#allocation7 + $0x1], 1 }
 0x5fe   :  { %893 = vsyncpa [#allocation9], 1 }

</bundles_post_ra>
